<compile_context>
chip_gen: v7x
topology: tpu7x:2x2x1
jax: 0.10.0
libtpu: 0.0.40
codegen_flags: <defaults>
</compile_context>

<pallas_src>
import functools

import numpy as np
import jax
import jax.numpy as jnp
from jax import lax
from jax.experimental import pallas as pl
from jax.experimental.pallas import tpu as pltpu

# (kernel_size, in_depth, out_depth, stride, padding) — mirrors self.conv1_layout in the module.
CONV1_LAYOUT = [(4, 1, 2, 1, 0), (2, 2, 4, 2, 0), (1, 4, 4, 1, 1), (1, 4, 1, 1, 1)]
CONV1_LAYOUT = [(4, 1, 2, 1, 0), (2, 2, 4, 2, 0), (1, 4, 4, 1, 0), (1, 4, 1, 1, 1)]  # spec order

N_CONV = len(CONV1_LAYOUT)
DPAD = 128                  # every flattened hidden/output dim padded to one full lane tile


def _round_up(n, m):
    return ((n + m - 1) // m) * m


def _cdiv(a, b):
    return (a + b - 1) // b


def conv1d_out_len(L_in, k, stride, pad):
    return (L_in + 2 * pad - k) // stride + 1


def conv1d_to_toeplitz(w, b, L_in, stride, pad):
    """Exact dense-matrix form of Conv1d (cross-correlation, PyTorch semantics).

    w: (C_out, C_in, K), b: (C_out,)
    Returns M: (C_in*L_in, C_out*L_out), bias: (C_out*L_out,), L_out.
    Flattening convention: channel-major, flat index = c*L + position.
    """
    C_out, C_in, K = w.shape
    L_out = conv1d_out_len(L_in, K, stride, pad)
    M = np.zeros((C_in * L_in, C_out * L_out), dtype=np.float32)
    wn = np.asarray(w, dtype=np.float32)
    for co in range(C_out):
        for ci in range(C_in):
            for t in range(L_out):
                for j in range(K):
                    p = stride * t + j - pad
                    if 0 <= p < L_in:
                        M[ci * L_in + p, co * L_out + t] = wn[co, ci, j]
    bias = np.repeat(np.asarray(b, dtype=np.float32), L_out)
    return M, bias, L_out


def prepare_params(w1, b1, convs, dtype=jnp.bfloat16):
    """Pack all parameters ONCE (hoisted out of the forward path) into two bf16 slabs.

    Returns:
      w0:   (IN1_PAD, 128)  — Linear weight (transposed) with the bias as an extra row that is
                              driven by the constant-1 lane of the kernel input.
      wc:   (N_CONV, 128, 128) — exact Toeplitz matrices of the convs; 2*bias folded into the
                              first padded row (that lane is exactly sigmoid(0)=0.5 at runtime).
      out_dim: true (unpadded) flattened output width of the last conv.
      in1_pad: lane width of the packed kernel input ([x | key | 1 | 0-pad]).
    """
    w1n = np.asarray(w1, dtype=np.float32)
    b1n = np.asarray(b1, dtype=np.float32)
    out_f, in_f = w1n.shape                       # (2*plaintext, plaintext+sharedkey)
    assert out_f <= DPAD, "flattened Linear output must fit one lane tile"

    in1 = in_f + 1                                # + constant-1 lane for the bias
    in1_pad = _round_up(in1, 8)

    w0 = np.zeros((in1_pad, DPAD), dtype=np.float32)
    w0[:in_f, :out_f] = w1n.T
    w0[in_f, :out_f] = b1n                        # bias row, hit by the constant-1 input lane

    wc = np.zeros((N_CONV, DPAD, DPAD), dtype=np.float32)
    d_in = out_f                                  # after Linear: C=1, L=2*plaintext
    Lc = out_f
    for li, (w, b, stride, pad) in enumerate(convs):
        M, bias, Lc = conv1d_to_toeplitz(w, b, Lc, stride, pad)
        d_out = M.shape[1]
        assert d_out <= DPAD, "flattened conv output must fit one lane tile"
        # bias folding relies on lane d_in of the incoming activation being EXACTLY 0 pre-sigmoid
        # (hence 0.5 post-sigmoid); assert the row is free before we claim it.
        assert d_in < DPAD, "need at least one padded row to fold the conv bias into"
        wc[li, :d_in, :d_out] = M
        assert not np.any(wc[li, d_in]), "bias row must be all-zero in the Toeplitz part"
        wc[li, d_in, :d_out] = 2.0 * bias         # 0.5 (sigmoid of padded 0-lane) * 2*bias = bias
        d_in = d_out

    return jnp.asarray(w0, dtype), jnp.asarray(wc, dtype), int(d_in), int(in1_pad)


def communicator_kernel(xk_ref, w0_ref, wc_ref, out_ref):
    # Layer 0 (Linear): (TB, IN1_PAD) bf16 @ (IN1_PAD, 128) bf16 -> f32.  The constant-1 lane of
    # xk supplies the bias; zero-padded lanes/rows keep padded output lanes exactly 0.
    h = jnp.dot(xk_ref[...], w0_ref[...], preferred_element_type=jnp.float32)
    # 4x [Sigmoid, Conv1d-as-Toeplitz-matmul].  Sigmoid stays f32 (EUP); only the dot operand is
    # cast to bf16.  Padded lanes are sigmoid(0)=0.5 and hit the 2*bias row -> exact bias add;
    # all other padded rows/cols are zero so padded lanes stay exactly 0 after every matmul.
    for i in range(N_CONV):
        s = jax.nn.sigmoid(h).astype(jnp.bfloat16)
        h = jnp.dot(s, wc_ref[i], preferred_element_type=jnp.float32)
    out_ref[...] = jnp.tanh(h)


def init_params(plaintext, sharedkey, key):
    """Deterministic PyTorch-default-style init (uniform +/- 1/sqrt(fan_in))."""
    in_f = plaintext + sharedkey
    out_f = 2 * plaintext
    keys = jax.random.split(key, 2 + 2 * len(CONV1_LAYOUT))
    bound = 1.0 / np.sqrt(in_f)
    w1 = jax.random.uniform(keys[0], (out_f, in_f), jnp.float32, -bound, bound)
    b1 = jax.random.uniform(keys[1], (out_f,), jnp.float32, -bound, bound)
    convs = []
    for i, (k, cin, cout, stride, pad) in enumerate(CONV1_LAYOUT):
        bnd = 1.0 / np.sqrt(cin * k)
        w = jax.random.uniform(keys[2 + 2 * i], (cout, cin, k), jnp.float32, -bnd, bnd)
        b = jax.random.uniform(keys[3 + 2 * i], (cout,), jnp.float32, -bnd, bnd)
        convs.append((w, b, stride, pad))
    return w1, b1, convs


@functools.partial(jax.jit, static_argnames=("out_dim",))
def communicator_forward(x, shared_key, w0, wc, out_dim):
    """Pallas implementation of BaseCommunicatorModel.forward(x, shared_key)."""
    B, P = x.shape
    K = shared_key.shape[1]
    in1_pad = w0.shape[0]
    assert P + K + 1 <= in1_pad

    # Batch tiling: one big tile for B <= 1024; otherwise an even number of <=~1024-row tiles so
    # the "parallel" grid axis lands on both v7x TensorCores (and each step stays well above the
    # ~0.35us per-grid-step pipeline overhead).
    B_pad = _round_up(max(B, 1), 8)
    if B_pad <= 1024:
        TB = B_pad
        n_tiles = 1
    else:
        n_tiles = 2 * _cdiv(B_pad, 2048)
        TB = _round_up(_cdiv(B_pad, n_tiles), 8)
        B_pad = TB * n_tiles

    # Narrow bf16 input slab: [x | shared_key | 1 | 0-pad] — the concat/reshape of the module is
    # just this flattened row; the constant-1 lane drives the Linear bias inside the kernel.
    xk = jnp.zeros((B_pad, in1_pad), jnp.bfloat16)
    xk = xk.at[:B, :P].set(x.astype(jnp.bfloat16))
    xk = xk.at[:B, P:P + K].set(shared_key.astype(jnp.bfloat16))
    xk = xk.at[:B, P + K].set(1.0)

    cost = pl.CostEstimate(
        flops=2 * B_pad * (in1_pad * DPAD + N_CONV * DPAD * DPAD),
        transcendentals=B_pad * DPAD * (N_CONV + 1),
        bytes_accessed=(2 * (B_pad * in1_pad + in1_pad * DPAD + N_CONV * DPAD * DPAD)
                        + 4 * B_pad * DPAD),
    )

    out = pl.pallas_call(
        communicator_kernel,
        out_shape=jax.ShapeDtypeStruct((B_pad, DPAD), jnp.float32),
        grid_spec=pltpu.PrefetchScalarGridSpec(
            num_scalar_prefetch=0,
            grid=(n_tiles,),
            in_specs=[
                pl.BlockSpec((TB, in1_pad), lambda i: (i, 0)),            # activations (bf16)
                pl.BlockSpec((in1_pad, DPAD), lambda i: (0, 0)),          # Linear weight+bias
                pl.BlockSpec((N_CONV, DPAD, DPAD), lambda i: (0, 0, 0)),  # conv Toeplitz slabs
            ],
            out_specs=pl.BlockSpec((TB, DPAD), lambda i: (i, 0)),
        ),
        compiler_params=pltpu.CompilerParams(dimension_semantics=("parallel",)),
        cost_estimate=cost,
    )(xk, w0, wc)

    return out[:B, :out_dim]


def reference_forward(x, shared_key, w1, b1, convs):
    """Pure-JAX f32 reference matching the PyTorch forward exactly (for verification)."""
    h = jnp.concatenate([x, shared_key], axis=1).astype(jnp.float32)
    h = h @ w1.T + b1
    h = h[:, None, :]                                 # (B, 1, 2*plaintext)  == NCL
    for (w, b, stride, pad) in convs:
        h = jax.nn.sigmoid(h)
        h = lax.conv_general_dilated(h, w, window_strides=(stride,),
                                     padding=[(pad, pad)],
                                     dimension_numbers=('NCH', 'OIH', 'NCH'))
        h = h + b[None, :, None]
    return jnp.tanh(h.reshape(h.shape[0], -1))


if __name__ == "__main__":
    plaintext, sharedkey, batch = 16, 16, 2
    key = jax.random.PRNGKey(0)
    kx, kk, kp = jax.random.split(key, 3)
    x = jax.random.uniform(kx, (batch, plaintext), jnp.float32, -1.0, 1.0)
    shared = jax.random.uniform(kk, (batch, sharedkey), jnp.float32, -1.0, 1.0)
    w1, b1, convs = init_params(plaintext, sharedkey, kp)

    # Parameter packing (Toeplitz build, transpose, bias folding, bf16 cast) happens once.
    w0, wc, out_dim, _ = prepare_params(w1, b1, convs)

    out = communicator_forward(x, shared, w0, wc, out_dim)
    out = jax.block_until_ready(out)

    ref = reference_forward(x, shared, w1, b1, convs)
    assert out.shape == ref.shape, (out.shape, ref.shape)
    # bf16 matmul operands with f32 accumulation: tolerance relaxed vs. the pure-f32 reference.
    np.testing.assert_allclose(np.asarray(out), np.asarray(ref), rtol=2e-2, atol=2e-2)
    print("KERNEL_OK")
</pallas_src>

<mosaic_0001>
module attributes {stable_mosaic.version = 11 : i64} {
  func.func @communicator_kernel(%arg0: i32, %arg1: memref<8x40xbf16, #tpu.memory_space<vmem>>, %arg2: memref<40x128xbf16, #tpu.memory_space<vmem>>, %arg3: memref<4x128x128xbf16, #tpu.memory_space<vmem>>, %arg4: memref<8x128xf32, #tpu.memory_space<vmem>>) attributes {dimension_semantics = [#tpu.dimension_semantics<parallel>], iteration_bounds = array<i64: 1>, scalar_prefetch = 0 : i64, scratch_operands = 0 : i64, tpu.core_type = #tpu.core_type<tc>, window_params = [{transform_indices = @transform_0, window_bounds = array<i64: 8, 40>}, {pipeline_mode = #tpu.pipeline_mode<synchronous>, transform_indices = @transform_1, window_bounds = array<i64: 40, 128>}, {pipeline_mode = #tpu.pipeline_mode<synchronous>, transform_indices = @transform_2, window_bounds = array<i64: 4, 128, 128>}, {transform_indices = @transform_3, window_bounds = array<i64: 8, 128>}]} {
    %c0 = arith.constant 0 : index
    %c0_0 = arith.constant 0 : index
    %0 = vector.load %arg1[%c0, %c0_0] : memref<8x40xbf16, #tpu.memory_space<vmem>>, vector<8x40xbf16>
    %c0_1 = arith.constant 0 : index
    %c0_2 = arith.constant 0 : index
    %1 = vector.load %arg2[%c0_1, %c0_2] : memref<40x128xbf16, #tpu.memory_space<vmem>>, vector<40x128xbf16>
    %cst = arith.constant dense<0.000000e+00> : vector<8x128xf32>
    %2 = tpu.matmul %0, %1, %cst {dimension_numbers = #tpu.dot_dimension_numbers<[1], [0], [0], [1], [0, 0, 1, 1], [], []>} : vector<8x40xbf16>, vector<40x128xbf16>, vector<8x128xf32> -> vector<8x128xf32>
    %3 = arith.negf %2 : vector<8x128xf32>
    %4 = math.exp %3 : vector<8x128xf32>
    %cst_3 = arith.constant 1.000000e+00 : f32
    %5 = vector.broadcast %cst_3 : f32 to vector<8x128xf32>
    %6 = arith.addf %5, %4 : vector<8x128xf32>
    %7 = arith.divf %5, %6 : vector<8x128xf32>
    %8 = arith.truncf %7 : vector<8x128xf32> to vector<8x128xbf16>
    %c0_4 = arith.constant 0 : index
    %c0_5 = arith.constant 0 : index
    %c0_6 = arith.constant 0 : index
    %9 = vector.load %arg3[%c0_4, %c0_5, %c0_6] : memref<4x128x128xbf16, #tpu.memory_space<vmem>>, vector<1x128x128xbf16>
    %10 = vector.shape_cast %9 : vector<1x128x128xbf16> to vector<128x128xbf16>
    %cst_7 = arith.constant dense<0.000000e+00> : vector<8x128xf32>
    %11 = tpu.matmul %8, %10, %cst_7 {dimension_numbers = #tpu.dot_dimension_numbers<[1], [0], [0], [1], [0, 0, 1, 1], [], []>} : vector<8x128xbf16>, vector<128x128xbf16>, vector<8x128xf32> -> vector<8x128xf32>
    %12 = arith.negf %11 : vector<8x128xf32>
    %13 = math.exp %12 : vector<8x128xf32>
    %cst_8 = arith.constant 1.000000e+00 : f32
    %14 = vector.broadcast %cst_8 : f32 to vector<8x128xf32>
    %15 = arith.addf %14, %13 : vector<8x128xf32>
    %16 = arith.divf %14, %15 : vector<8x128xf32>
    %17 = arith.truncf %16 : vector<8x128xf32> to vector<8x128xbf16>
    %c1 = arith.constant 1 : index
    %c0_9 = arith.constant 0 : index
    %c0_10 = arith.constant 0 : index
    %18 = vector.load %arg3[%c1, %c0_9, %c0_10] : memref<4x128x128xbf16, #tpu.memory_space<vmem>>, vector<1x128x128xbf16>
    %19 = vector.shape_cast %18 : vector<1x128x128xbf16> to vector<128x128xbf16>
    %cst_11 = arith.constant dense<0.000000e+00> : vector<8x128xf32>
    %20 = tpu.matmul %17, %19, %cst_11 {dimension_numbers = #tpu.dot_dimension_numbers<[1], [0], [0], [1], [0, 0, 1, 1], [], []>} : vector<8x128xbf16>, vector<128x128xbf16>, vector<8x128xf32> -> vector<8x128xf32>
    %21 = arith.negf %20 : vector<8x128xf32>
    %22 = math.exp %21 : vector<8x128xf32>
    %cst_12 = arith.constant 1.000000e+00 : f32
    %23 = vector.broadcast %cst_12 : f32 to vector<8x128xf32>
    %24 = arith.addf %23, %22 : vector<8x128xf32>
    %25 = arith.divf %23, %24 : vector<8x128xf32>
    %26 = arith.truncf %25 : vector<8x128xf32> to vector<8x128xbf16>
    %c2 = arith.constant 2 : index
    %c0_13 = arith.constant 0 : index
    %c0_14 = arith.constant 0 : index
    %27 = vector.load %arg3[%c2, %c0_13, %c0_14] : memref<4x128x128xbf16, #tpu.memory_space<vmem>>, vector<1x128x128xbf16>
    %28 = vector.shape_cast %27 : vector<1x128x128xbf16> to vector<128x128xbf16>
    %cst_15 = arith.constant dense<0.000000e+00> : vector<8x128xf32>
    %29 = tpu.matmul %26, %28, %cst_15 {dimension_numbers = #tpu.dot_dimension_numbers<[1], [0], [0], [1], [0, 0, 1, 1], [], []>} : vector<8x128xbf16>, vector<128x128xbf16>, vector<8x128xf32> -> vector<8x128xf32>
    %30 = arith.negf %29 : vector<8x128xf32>
    %31 = math.exp %30 : vector<8x128xf32>
    %cst_16 = arith.constant 1.000000e+00 : f32
    %32 = vector.broadcast %cst_16 : f32 to vector<8x128xf32>
    %33 = arith.addf %32, %31 : vector<8x128xf32>
    %34 = arith.divf %32, %33 : vector<8x128xf32>
    %35 = arith.truncf %34 : vector<8x128xf32> to vector<8x128xbf16>
    %c3 = arith.constant 3 : index
    %c0_17 = arith.constant 0 : index
    %c0_18 = arith.constant 0 : index
    %36 = vector.load %arg3[%c3, %c0_17, %c0_18] : memref<4x128x128xbf16, #tpu.memory_space<vmem>>, vector<1x128x128xbf16>
    %37 = vector.shape_cast %36 : vector<1x128x128xbf16> to vector<128x128xbf16>
    %cst_19 = arith.constant dense<0.000000e+00> : vector<8x128xf32>
    %38 = tpu.matmul %35, %37, %cst_19 {dimension_numbers = #tpu.dot_dimension_numbers<[1], [0], [0], [1], [0, 0, 1, 1], [], []>} : vector<8x128xbf16>, vector<128x128xbf16>, vector<8x128xf32> -> vector<8x128xf32>
    %39 = math.tanh %38 : vector<8x128xf32>
    %c0_20 = arith.constant 0 : index
    %c0_21 = arith.constant 0 : index
    %40 = vector.load %arg4[%c0_20, %c0_21] : memref<8x128xf32, #tpu.memory_space<vmem>>, vector<8x128xf32>
    tpu.vector_store %arg4[%c0_20, %c0_21], %39 {strides = array<i32>} : memref<8x128xf32, #tpu.memory_space<vmem>>, vector<8x128xf32>,
    return
  }
  func.func @transform_0(%arg0: i32) -> (i32, i32) {
    %c0_i32 = arith.constant 0 : i32
    %c0_i32_0 = arith.constant 0 : i32
    return %arg0, %c0_i32 : i32, i32
  }
  func.func @transform_1(%arg0: i32) -> (i32, i32) {
    %c0_i32 = arith.constant 0 : i32
    %c0_i32_0 = arith.constant 0 : i32
    %c0_i32_1 = arith.constant 0 : i32
    return %c0_i32, %c0_i32_0 : i32, i32
  }
  func.func @transform_2(%arg0: i32) -> (i32, i32, i32) {
    %c0_i32 = arith.constant 0 : i32
    %c0_i32_0 = arith.constant 0 : i32
    %c0_i32_1 = arith.constant 0 : i32
    %c0_i32_2 = arith.constant 0 : i32
    return %c0_i32, %c0_i32_0, %c0_i32_1 : i32, i32, i32
  }
  func.func @transform_3(%arg0: i32) -> (i32, i32) {
    %c0_i32 = arith.constant 0 : i32
    %c0_i32_0 = arith.constant 0 : i32
    return %arg0, %c0_i32 : i32, i32
  }
}

</mosaic_0001>

<bundles_post_ra>
// kernel: communicator_forward.1
= control target key start
LH: loop header
LB: loop body
LE: loop exit
PB: predicated region body
PF: predicated region fallthrough
CT: control target
= control target key end

     0   :  { %8 = vsyncpa [#allocation3], 0  ;;  %s804_s12 = smov [#allocation2]   ;;  %s901_s0 = inlined_call_operand.vmem [shape: bf16[8,40], index: 0, kind: input, shape index: {}]   ;;  %s902_s1 = inlined_call_operand.vmem [shape: bf16[40,128], index: 1, kind: input, shape index: {}]   ;;  %s903_s2 = inlined_call_operand.hbm [shape: bf16[4,128,128], index: 2, kind: input, shape index: {}]   ;;  %s904_s3 = inlined_call_operand.vmem [shape: f32[8,128], index: 3, kind: output, shape index: {}]  }
   0x1   :  { %s18_s13 = sshll.u32 %s804_s12, 4  ;;  %s780_s16 = scalar_lea.hbm %s903_s2, 4096  ;;  %s19_s13 = int_to_ptr.vmem [resolvable:$true] %s18_s13 }
   0x2   :  { %p781_p0 = scmp.ne.s32.totalorder %s903_s2, %s780_s16  ;;  %p784_p1 = scmp.lt.u32.totalorder %s780_s16, %s903_s2 }
   0x4   :  { %p786_p2 = pnand %p784_p1, %p781_p0 }
   0x6   :  { %789 = shalt.err (!%p786_p2)
}
   0x7   :  { %s790_s21 = scalar_lea.vmem %s19_s13, 4096  ;;  %p795_p4 = scmp.lt.s32.totalorder %s19_s13, %s19_s13 }
   0x8   :  { %p791_p3 = scmp.ne.s32.totalorder %s19_s13, %s790_s21  ;;  %p796_p5 = scmp.lt.s32.totalorder %s790_s21, %s790_s21 }
   0xa   :  { %p797_p6 = por %p796_p5, %p795_p4 }
   0xc   :  { %p798_p7 = pnand %p797_p6, %p791_p3 }
   0xe   :  { %801 = shalt.err (!%p798_p7)
}
   0xf   :  { %s805_s22 = smov 64   ;;  %s806_s23 = smov 4  }
  0x10   :  { %24 = dma.hbm_to_vmem [thread:$0]  %s903_s2, 4096, %s19_s13, [#allocation3], %s805_s22, %s805_s22, %s806_s23  }
  0x11   :  { %802 = dma.done.wait [#allocation3], 4096  }
  0x12   :  { %803 = vsyncadd [#allocation3], 4294963200  ;;  %v807_v0 = vmov 0.0   ;;  %vm808_vm0 = vmmov 0   ;;  %v727_v1 = vld [vmem:[%s902_s1] sm:$0xff]   ;;  %vm54_vm1 = vcmask 1043456  }
  0x13   :  { %632 = vmatprep.subr.bf16.mxu0 %v807_v0  ;;  %638 = vmatprep.mubr.msk.bf16.mxu0 %vm808_vm0, %v807_v0  ;;  %v728_v2 = vld [vmem:[%s902_s1 + $0x8] sm:$0xff]   ;;  %v729_v3 = vld [vmem:[%s902_s1 + $0x10] ss:$0 sps:$4 sm:$0xff]   ;;  %v730_v4 = vld [vmem:[#allocation2] sm:$0xff]   ;;  %vm50_vm2 = vcmask 326656  }
  0x14   :  { %642 = vmatprep.subr.bf16.mxu1 %v807_v0  ;;  %658 = vmatprep.mubr.msk.bf16.mxu1 %vm808_vm0, %v807_v0  ;;  %v56_v5 = vsel %vm54_vm1, %v729_v3, 0  ;;  %v29_v6 = vld [vmem:[%s901_s0] sm:$0xf]  ;;  %v731_v7 = vld [vmem:[#allocation2 + $0x8] sm:$0xff]   ;;  %v732_v8 = vld [vmem:[#allocation2 + $0x10] sm:$0xff]  }
  0x15   :  { %633 = vmatpush3.bf16.msra.mxu0 %v727_v1  ;;  %643 = vmatpush3.bf16.msra.mxu1 %v730_v4  ;;  %v733_v9 = vld [vmem:[#allocation2 + $0x18] sm:$0xff]   ;;  %v734_v10 = vld [vmem:[#allocation2 + $0x20] sm:$0xff]   ;;  %v735_v11 = vld [vmem:[#allocation2 + $0x28] sm:$0xff]  }
  0x16   :  { %634 = vmatprep.subr.bf16.mxu0 %v807_v0  ;;  %644 = vmatprep.subr.bf16.mxu1 %v807_v0  ;;  %v736_v12 = vld [vmem:[#allocation2 + $0x30] sm:$0xff]   ;;  %v737_v13 = vld [vmem:[#allocation2 + $0x38] sm:$0xff]   ;;  %v738_v14 = vld [vmem:[#allocation2 + $0x40] sm:$0xff]  }
  0x17   :  { %v739_v24 = vld [vmem:[#allocation2 + $0x48] sm:$0xff]   ;;  %v740_v25 = vld [vmem:[#allocation2 + $0x50] sm:$0xff]   ;;  %v741_v26 = vld [vmem:[#allocation2 + $0x58] sm:$0xff]  }
  0x18   :  { %v742_v27 = vld [vmem:[#allocation2 + $0x60] sm:$0xff]   ;;  %v743_v28 = vld [vmem:[#allocation2 + $0x68] sm:$0xff]   ;;  %v744_v29 = vld [vmem:[#allocation2 + $0x70] sm:$0xff]  }
  0x19   :  { %635 = vmatpush3.bf16.msra.mxu0 %v728_v2  ;;  %645 = vmatpush3.bf16.msra.mxu1 %v731_v7  ;;  %v745_v30 = vld [vmem:[#allocation2 + $0x78] sm:$0xff]   ;;  %v746_v31 = vld [vmem:[#allocation2 + $0x80] sm:$0xff]   ;;  %v747_v41 = vld [vmem:[#allocation2 + $0x88] sm:$0xff]  }
  0x1a   :  { %636 = vmatprep.subr.bf16.mxu0 %v807_v0  ;;  %646 = vmatprep.subr.bf16.mxu1 %v807_v0  ;;  %v748_v42 = vld [vmem:[#allocation2 + $0x90] sm:$0xff]   ;;  %v749_v43 = vld [vmem:[#allocation2 + $0x98] sm:$0xff]   ;;  %v750_v44 = vld [vmem:[#allocation2 + $0xa0] sm:$0xff]  }
  0x1b   :  { %v751_v45 = vld [vmem:[#allocation2 + $0xa8] sm:$0xff]   ;;  %v752_v46 = vld [vmem:[#allocation2 + $0xb0] sm:$0xff]   ;;  %v753_v47 = vld [vmem:[#allocation2 + $0xb8] sm:$0xff]  }
  0x1c   :  { %v754_v48 = vld [vmem:[#allocation2 + $0xc0] sm:$0xff]   ;;  %v755_v58 = vld [vmem:[#allocation2 + $0xc8] sm:$0xff]   ;;  %v756_v59 = vld [vmem:[#allocation2 + $0xd0] sm:$0xff]  }
  0x1d   :  { %637 = vmatpush3.bf16.msra.mxu0 %v56_v5  ;;  %647 = vmatpush3.bf16.msra.mxu1 %v732_v8  ;;  %v757_v60 = vld [vmem:[#allocation2 + $0xd8] sm:$0xff]   ;;  %v758_v61 = vld [vmem:[#allocation2 + $0xe0] sm:$0xff]   ;;  %v759_v62 = vld [vmem:[#allocation2 + $0xe8] sm:$0xff]  }
  0x1e   :  { %662 = vmatprep.subr.bf16.mxu0 %v807_v0  ;;  %648 = vmatprep.subr.bf16.mxu1 %v807_v0  ;;  %v760_v63 = vld [vmem:[#allocation2 + $0xf0] sm:$0xff]   ;;  %v761_v1 = vld [vmem:[#allocation2 + $0xf8] sm:$0xff]  }
  0x20   :  { %639 = vmatmul.mubr.msk.bf16.vlgmr.msra.gmra.mrb[0].mxu0 %vm50_vm2, %v29_v6 }
  0x21   :  { %678 = vmatprep.mubr.msk.bf16.mxu0 %vm808_vm0, %v807_v0  ;;  %649 = vmatpush3.bf16.msra.mxu1 %v733_v9 }
  0x22   :  { %650 = vmatprep.subr.bf16.mxu1 %v807_v0  ;;  %663 = vmatpush3.bf16.msra.mxu0 %v738_v14 }
  0x23   :  { %664 = vmatprep.subr.bf16.mxu0 %v807_v0 }
  0x25   :  { %651 = vmatpush3.bf16.msra.mxu1 %v734_v10 }
  0x26   :  { %652 = vmatprep.subr.bf16.mxu1 %v807_v0  ;;  %665 = vmatpush3.bf16.msra.mxu0 %v739_v24 }
  0x27   :  { %666 = vmatprep.subr.bf16.mxu0 %v807_v0 }
  0x29   :  { %653 = vmatpush3.bf16.msra.mxu1 %v735_v11 }
  0x2a   :  { %654 = vmatprep.subr.bf16.mxu1 %v807_v0  ;;  %667 = vmatpush3.bf16.msra.mxu0 %v740_v25 }
  0x2b   :  { %668 = vmatprep.subr.bf16.mxu0 %v807_v0 }
  0x2d   :  { %655 = vmatpush3.bf16.msra.mxu1 %v736_v12 }
  0x2e   :  { %656 = vmatprep.subr.bf16.mxu1 %v807_v0  ;;  %669 = vmatpush3.bf16.msra.mxu0 %v741_v26 }
  0x2f   :  { %670 = vmatprep.subr.bf16.mxu0 %v807_v0 }
  0x31   :  { %657 = vmatpush3.bf16.msra.mxu1 %v737_v13 }
  0x32   :  { %682 = vmatprep.subr.bf16.mxu1 %v807_v0  ;;  %671 = vmatpush3.bf16.msra.mxu0 %v742_v27 }
  0x33   :  { %672 = vmatprep.subr.bf16.mxu0 %v807_v0 }
  0x36   :  { %673 = vmatpush3.bf16.msra.mxu0 %v743_v28 }
  0x37   :  { %674 = vmatprep.subr.bf16.mxu0 %v807_v0 }
  0x3a   :  { %675 = vmatpush3.bf16.msra.mxu0 %v744_v29 }
  0x3b   :  { %676 = vmatprep.subr.bf16.mxu0 %v807_v0 }
  0x3e   :  { %677 = vmatpush3.bf16.msra.mxu0 %v745_v30 }
  0x3f   :  { %702 = vmatprep.subr.bf16.mxu0 %v807_v0 }
  0xf3   :  { %v92_v15 = vpop.f32.mrb[0].mxu0 }
  0xf4   :  { %v556_v16 = vmul.f32 -1.442695, %v92_v15  ;;  %v640_v17 = vpop.f32.mrb[1].mxu0 }
  0xf5   :  { %v95_v18 = vpop.f32.mrb[2].mxu0 }
  0xf6   :  { %762 = vpow2.f32 %v556_v16  ;;  %v641_v19 = vpop.f32.mrb[3].mxu0 }
 0x100   :  { %v763_v20 = vpop.eup %762 }
 0x101   :  { %v101_v21 = vadd.f32 1.0, %v763_v20 }
 0x103   :  { %764 = vrcp.f32 %v101_v21 }
 0x10d   :  { %v765_v22 = vpop.eup %764 }
 0x10e   :  { %v104_v23 = vpack.c.bf16 %v765_v22, %v765_v22 }
 0x110   :  { %659 = vmatmul.mubr.bf16.vlgmr.msra.gmra.mrb[0].mxu1 %v104_v23 }
 0x111   :  { %698 = vmatprep.mubr.msk.bf16.mxu1 %vm808_vm0, %v807_v0  ;;  %683 = vmatpush3.bf16.msra.mxu1 %v746_v31 }
 0x112   :  { %684 = vmatprep.subr.bf16.mxu1 %v807_v0 }
 0x115   :  { %685 = vmatpush3.bf16.msra.mxu1 %v747_v41 }
 0x116   :  { %686 = vmatprep.subr.bf16.mxu1 %v807_v0 }
 0x119   :  { %687 = vmatpush3.bf16.msra.mxu1 %v748_v42 }
 0x11a   :  { %688 = vmatprep.subr.bf16.mxu1 %v807_v0 }
 0x11d   :  { %689 = vmatpush3.bf16.msra.mxu1 %v749_v43 }
 0x11e   :  { %690 = vmatprep.subr.bf16.mxu1 %v807_v0 }
 0x121   :  { %691 = vmatpush3.bf16.msra.mxu1 %v750_v44 }
 0x122   :  { %692 = vmatprep.subr.bf16.mxu1 %v807_v0 }
 0x125   :  { %693 = vmatpush3.bf16.msra.mxu1 %v751_v45 }
 0x126   :  { %694 = vmatprep.subr.bf16.mxu1 %v807_v0 }
 0x129   :  { %695 = vmatpush3.bf16.msra.mxu1 %v752_v46 }
 0x12a   :  { %696 = vmatprep.subr.bf16.mxu1 %v807_v0 }
 0x12d   :  { %697 = vmatpush3.bf16.msra.mxu1 %v753_v47 }
 0x1e3   :  { %v203_v32 = vpop.f32.mrb[0].mxu1 }
 0x1e4   :  { %v565_v33 = vmul.f32 -1.442695, %v203_v32  ;;  %v660_v34 = vpop.f32.mrb[1].mxu1 }
 0x1e5   :  { %v206_v35 = vpop.f32.mrb[2].mxu1 }
 0x1e6   :  { %766 = vpow2.f32 %v565_v33  ;;  %v661_v36 = vpop.f32.mrb[3].mxu1 }
 0x1f0   :  { %v767_v37 = vpop.eup %766 }
 0x1f1   :  { %v212_v38 = vadd.f32 1.0, %v767_v37 }
 0x1f3   :  { %768 = vrcp.f32 %v212_v38 }
 0x1fd   :  { %v769_v39 = vpop.eup %768 }
 0x1fe   :  { %v215_v40 = vpack.c.bf16 %v769_v39, %v769_v39 }
 0x200   :  { %679 = vmatmul.mubr.bf16.vlgmr.msra.gmra.mrb[4].mxu0 %v215_v40 }
 0x201   :  { %718 = vmatprep.mubr.msk.bf16.mxu0 %vm808_vm0, %v807_v0  ;;  %703 = vmatpush3.bf16.msra.mxu0 %v754_v48 }
 0x202   :  { %704 = vmatprep.subr.bf16.mxu0 %v807_v0 }
 0x205   :  { %705 = vmatpush3.bf16.msra.mxu0 %v755_v58 }
 0x206   :  { %706 = vmatprep.subr.bf16.mxu0 %v807_v0 }
 0x209   :  { %707 = vmatpush3.bf16.msra.mxu0 %v756_v59 }
 0x20a   :  { %708 = vmatprep.subr.bf16.mxu0 %v807_v0 }
 0x20d   :  { %709 = vmatpush3.bf16.msra.mxu0 %v757_v60 }
 0x20e   :  { %710 = vmatprep.subr.bf16.mxu0 %v807_v0 }
 0x211   :  { %711 = vmatpush3.bf16.msra.mxu0 %v758_v61 }
 0x212   :  { %712 = vmatprep.subr.bf16.mxu0 %v807_v0 }
 0x215   :  { %713 = vmatpush3.bf16.msra.mxu0 %v759_v62 }
 0x216   :  { %714 = vmatprep.subr.bf16.mxu0 %v807_v0 }
 0x219   :  { %715 = vmatpush3.bf16.msra.mxu0 %v760_v63 }
 0x21a   :  { %716 = vmatprep.subr.bf16.mxu0 %v807_v0 }
 0x21d   :  { %717 = vmatpush3.bf16.msra.mxu0 %v761_v1 }
 0x2d3   :  { %v315_v49 = vpop.f32.mrb[4].mxu0 }
 0x2d4   :  { %v574_v50 = vmul.f32 -1.442695, %v315_v49  ;;  %v680_v51 = vpop.f32.mrb[5].mxu0 }
 0x2d5   :  { %v318_v52 = vpop.f32.mrb[6].mxu0 }
 0x2d6   :  { %770 = vpow2.f32 %v574_v50  ;;  %v681_v53 = vpop.f32.mrb[7].mxu0 }
 0x2e0   :  { %v771_v54 = vpop.eup %770 }
 0x2e1   :  { %v324_v55 = vadd.f32 1.0, %v771_v54 }
 0x2e3   :  { %772 = vrcp.f32 %v324_v55 }
 0x2ed   :  { %v773_v56 = vpop.eup %772 }
 0x2ee   :  { %v327_v57 = vpack.c.bf16 %v773_v56, %v773_v56 }
 0x2f0   :  { %699 = vmatmul.mubr.bf16.vlgmr.msra.gmra.mrb[4].mxu1 %v327_v57 }
 0x3c3   :  { %v427_v2 = vpop.f32.mrb[4].mxu1 }
 0x3c4   :  { %v583_v3 = vmul.f32 -1.442695, %v427_v2  ;;  %v700_v4 = vpop.f32.mrb[5].mxu1 }
 0x3c5   :  { %v430_v5 = vpop.f32.mrb[6].mxu1 }
 0x3c6   :  { %774 = vpow2.f32 %v583_v3  ;;  %v701_v6 = vpop.f32.mrb[7].mxu1 }
 0x3d0   :  { %v775_v7 = vpop.eup %774 }
 0x3d1   :  { %v436_v8 = vadd.f32 1.0, %v775_v7 }
 0x3d3   :  { %776 = vrcp.f32 %v436_v8 }
 0x3dd   :  { %v777_v9 = vpop.eup %776 }
 0x3de   :  { %v439_v10 = vpack.c.bf16 %v777_v9, %v777_v9 }
 0x3e0   :  { %719 = vmatmul.mubr.bf16.vlgmr.msra.gmra.mrb[8].mxu0 %v439_v10 }
 0x4b3   :  { %v539_v11 = vpop.f32.mrb[8].mxu0 }
 0x4b4   :  { %778 = vtanh.f32 %v539_v11  ;;  %v720_v12 = vpop.f32.mrb[9].mxu0 }
 0x4b5   :  { %v542_v13 = vpop.f32.mrb[10].mxu0 }
 0x4b6   :  { %v721_v14 = vpop.f32.mrb[11].mxu0 }
 0x4be   :  { %v779_v0 = vpop.eup %778 }
 0x4bf   :  { %546 = vst [vmem:[%s904_s3] sm:$0xff] %v779_v0 }
 0x4c0   :  { %551 = vsyncpa [#allocation3], 1 }

</bundles_post_ra>
